<compile_context>
chip_gen: v7x
topology: tpu7x:2x2x1
jax: 0.10.0
libtpu: 0.0.40
codegen_flags: <defaults>
</compile_context>

<pallas_src>
import functools

import jax
import jax.numpy as jnp
from jax.experimental import pallas as pl
from jax.experimental.pallas import tpu as pltpu

IN_FEATURES = 16
OUT_FEATURES = 32
MIN_VALUE = -1.85
MAX_VALUE = 1.76  # unused: v3 is never returned by the PyTorch forward

PACK = 8                           # logical rows packed per lane-dense row
PACKED_IN = PACK * IN_FEATURES     # 128  (one full lane dimension)
PACKED_OUT = PACK * OUT_FEATURES   # 256  (two full lane dimensions)


def _round_up(n, m):
    return ((n + m - 1) // m) * m


def _linear_clamp_min_kernel(x_ref, w_ref, b_ref, o_ref):
    # One tile: (TB, 128) @ (128, 256) on the MXU, bias add + clamp_min on VPU.
    y = jnp.dot(x_ref[...], w_ref[...], preferred_element_type=jnp.float32)
    y = y + b_ref[...]              # (TB, 256) + (1, 256) broadcast
    y = jnp.maximum(y, MIN_VALUE)   # torch.clamp_min
    o_ref[...] = y.astype(o_ref.dtype)


def _pack_weight(w_t, b):
    """(16,32) W^T, (1,32) bias -> block-diag (128,256) weight, (1,256) bias.

    packed_w[j*16 + i, k*32 + o] = (j == k) * w_t[i, o], so that
    (x_packed @ packed_w)[r, k*32 + o] = (x @ W^T)[8r + k, o].
    """
    eye = jnp.eye(PACK, dtype=w_t.dtype)                       # (8, 8)
    w_bd = (eye[:, None, :, None] * w_t[None, :, None, :])      # (8,16,8,32)
    w_bd = w_bd.reshape(PACKED_IN, PACKED_OUT)                   # (128, 256)
    b_bd = jnp.tile(b.reshape(1, OUT_FEATURES), (1, PACK))       # (1, 256)
    return w_bd, b_bd


@functools.partial(jax.jit, static_argnames=("block_rows",))
def linear_clamp_min_pallas(x, w_t, b, *, block_rows=1024):
    """x: (B, 16) f32, w_t: (16, 32) f32, b: (1, 32) f32 -> (B, 32) f32."""
    B = x.shape[0]
    # Only pad to a multiple of 8 rows (<= 7 pad rows) for the lane-dense pack;
    # tile-divisibility is handled by the cdiv grid + masked last block.
    B8 = _round_up(B, PACK)
    if B8 != B:
        x = jnp.pad(x, ((0, B8 - B), (0, 0)))
    rows = B8 // PACK
    x_packed = x.reshape(rows, PACKED_IN)        # free, contiguous reshape
    w_bd, b_bd = _pack_weight(w_t, b)

    # Batch tile in packed rows (1024 packed rows == 8192 logical rows).
    # Double-buffered footprint at tile=1024: x 2*0.5 MiB + out 2*1 MiB +
    # resident W/b ~0.13 MiB -> ~3.2 MiB, fine on every generation.
    if rows <= block_rows:
        tile_rows = rows                         # full-dim block: always legal
    else:
        tile_rows = _round_up(block_rows, 8)     # keep sublane dim 8-aligned
    grid = (pl.cdiv(rows, tile_rows),)

    bytes_accessed = 4 * (x_packed.size + w_bd.size + b_bd.size
                          + rows * PACKED_OUT)
    out_packed = pl.pallas_call(
        _linear_clamp_min_kernel,
        out_shape=jax.ShapeDtypeStruct((rows, PACKED_OUT), jnp.float32),
        grid_spec=pl.GridSpec(
            grid=grid,
            in_specs=[
                # x: streamed per batch tile (double-buffered by Pallas).
                pl.BlockSpec((tile_rows, PACKED_IN), lambda i: (i, 0)),
                # Block-diag W and bias: constant index_map -> VMEM-resident.
                pl.BlockSpec((PACKED_IN, PACKED_OUT), lambda i: (0, 0)),
                pl.BlockSpec((1, PACKED_OUT), lambda i: (0, 0)),
            ],
            out_specs=pl.BlockSpec((tile_rows, PACKED_OUT), lambda i: (i, 0)),
        ),
        compiler_params=pltpu.CompilerParams(
            # Independent batch tiles -> shard across TCs on v7x.
            dimension_semantics=("parallel",),
            # Raises v5e's 16 MiB scoped default; safe under v7x's 32/64 MiB.
            vmem_limit_bytes=32 * 1024 * 1024,
        ),
        cost_estimate=pl.CostEstimate(
            flops=2 * rows * PACKED_IN * PACKED_OUT,
            transcendentals=0,
            bytes_accessed=bytes_accessed,
        ),
    )(x_packed, w_bd, b_bd)

    out = out_packed.reshape(B8, OUT_FEATURES)   # free, contiguous reshape
    return out[:B] if B8 != B else out


def linear_clamp_min(x, w_t, b, *, small_batch_threshold=16384):
    """Dispatcher: small batches are cheaper as a plain fused XLA expression."""
    if x.shape[0] < small_batch_threshold:
        return jnp.maximum(x @ w_t + b, MIN_VALUE)
    return linear_clamp_min_pallas(x, w_t, b)


if __name__ == "__main__":
    key = jax.random.PRNGKey(0)
    k_x, k_w, k_b, k_x2, k_x3 = jax.random.split(key, 5)

    # Deterministic parameter init (mimics nn.Linear uniform bound 1/sqrt(16)).
    bound = 1.0 / jnp.sqrt(jnp.float32(IN_FEATURES))
    w = jax.random.uniform(
        k_w, (OUT_FEATURES, IN_FEATURES), jnp.float32, -bound, bound
    )  # PyTorch layout (out, in)
    b = jax.random.uniform(k_b, (1, OUT_FEATURES), jnp.float32, -bound, bound)
    w_t = w.T  # (16, 32) so the kernel computes x @ W^T

    # Small input consistent with the module's x1 = randn(1, 16); batch=2.
    x_small = jax.random.normal(k_x, (2, IN_FEATURES), jnp.float32)
    out_small = linear_clamp_min_pallas(x_small, w_t, b)
    jax.block_until_ready(out_small)
    ref_small = jnp.maximum(x_small @ w_t + b, MIN_VALUE)
    assert out_small.shape == (2, OUT_FEATURES)
    assert jnp.allclose(out_small, ref_small, atol=1e-5, rtol=1e-5)

    # Multi-tile grid with a masked partial last block (rows=1250, tile=1024).
    x_big = jax.random.normal(k_x2, (10000, IN_FEATURES), jnp.float32)
    out_big = linear_clamp_min_pallas(x_big, w_t, b)
    jax.block_until_ready(out_big)
    ref_big = jnp.maximum(x_big @ w_t + b, MIN_VALUE)
    assert out_big.shape == (10000, OUT_FEATURES)
    assert jnp.allclose(out_big, ref_big, atol=1e-5, rtol=1e-5)

    # Non-multiple-of-8 batch exercises the tiny pad + slice path.
    x_odd = jax.random.normal(k_x3, (1001, IN_FEATURES), jnp.float32)
    out_odd = linear_clamp_min_pallas(x_odd, w_t, b)
    jax.block_until_ready(out_odd)
    ref_odd = jnp.maximum(x_odd @ w_t + b, MIN_VALUE)
    assert out_odd.shape == (1001, OUT_FEATURES)
    assert jnp.allclose(out_odd, ref_odd, atol=1e-5, rtol=1e-5)

    print("KERNEL_OK")
</pallas_src>

<mosaic_0001>
module attributes {stable_mosaic.version = 11 : i64} {
  func.func @_linear_clamp_min_kernel(%arg0: i32, %arg1: memref<1x128xf32, #tpu.memory_space<vmem>>, %arg2: memref<128x256xf32, #tpu.memory_space<vmem>>, %arg3: memref<1x256xf32, #tpu.memory_space<vmem>>, %arg4: memref<1x256xf32, #tpu.memory_space<vmem>>) attributes {dimension_semantics = [#tpu.dimension_semantics<parallel>], iteration_bounds = array<i64: 1>, scalar_prefetch = 0 : i64, scratch_operands = 0 : i64, tpu.core_type = #tpu.core_type<tc>, window_params = [{transform_indices = @transform_0, window_bounds = array<i64: 1, 128>}, {pipeline_mode = #tpu.pipeline_mode<synchronous>, transform_indices = @transform_1, window_bounds = array<i64: 128, 256>}, {pipeline_mode = #tpu.pipeline_mode<synchronous>, transform_indices = @transform_2, window_bounds = array<i64: 1, 256>}, {transform_indices = @transform_3, window_bounds = array<i64: 1, 256>}]} {
    %c0 = arith.constant 0 : index
    %c0_0 = arith.constant 0 : index
    %0 = vector.load %arg1[%c0, %c0_0] : memref<1x128xf32, #tpu.memory_space<vmem>>, vector<1x128xf32>
    %c0_1 = arith.constant 0 : index
    %c0_2 = arith.constant 0 : index
    %1 = vector.load %arg2[%c0_1, %c0_2] : memref<128x256xf32, #tpu.memory_space<vmem>>, vector<128x256xf32>
    %cst = arith.constant dense<0.000000e+00> : vector<1x256xf32>
    %2 = tpu.matmul %0, %1, %cst {dimension_numbers = #tpu.dot_dimension_numbers<[1], [0], [0], [1], [0, 0, 1, 1], [], []>} : vector<1x128xf32>, vector<128x256xf32>, vector<1x256xf32> -> vector<1x256xf32>
    %c0_3 = arith.constant 0 : index
    %c0_4 = arith.constant 0 : index
    %3 = vector.load %arg3[%c0_3, %c0_4] : memref<1x256xf32, #tpu.memory_space<vmem>>, vector<1x256xf32>
    %4 = arith.addf %2, %3 : vector<1x256xf32>
    %cst_5 = arith.constant -1.850000e+00 : f32
    %5 = vector.broadcast %cst_5 : f32 to vector<1x256xf32>
    %6 = arith.maximumf %4, %5 : vector<1x256xf32>
    %c0_6 = arith.constant 0 : index
    %c0_7 = arith.constant 0 : index
    %7 = vector.load %arg4[%c0_6, %c0_7] : memref<1x256xf32, #tpu.memory_space<vmem>>, vector<1x256xf32>
    tpu.vector_store %arg4[%c0_6, %c0_7], %6 {strides = array<i32>} : memref<1x256xf32, #tpu.memory_space<vmem>>, vector<1x256xf32>,
    return
  }
  func.func @transform_0(%arg0: i32) -> (i32, i32) {
    %c0_i32 = arith.constant 0 : i32
    %c0_i32_0 = arith.constant 0 : i32
    return %arg0, %c0_i32 : i32, i32
  }
  func.func @transform_1(%arg0: i32) -> (i32, i32) {
    %c0_i32 = arith.constant 0 : i32
    %c0_i32_0 = arith.constant 0 : i32
    %c0_i32_1 = arith.constant 0 : i32
    return %c0_i32, %c0_i32_0 : i32, i32
  }
  func.func @transform_2(%arg0: i32) -> (i32, i32) {
    %c0_i32 = arith.constant 0 : i32
    %c0_i32_0 = arith.constant 0 : i32
    %c0_i32_1 = arith.constant 0 : i32
    return %c0_i32, %c0_i32_0 : i32, i32
  }
  func.func @transform_3(%arg0: i32) -> (i32, i32) {
    %c0_i32 = arith.constant 0 : i32
    %c0_i32_0 = arith.constant 0 : i32
    return %arg0, %c0_i32 : i32, i32
  }
}

</mosaic_0001>

<bundles_post_ra>
// kernel: linear_clamp_min_pallas.1
= control target key start
LH: loop header
LB: loop body
LE: loop exit
PB: predicated region body
PF: predicated region fallthrough
CT: control target
= control target key end

     0   :  { %v193_v3 = vmov 0.0   ;;  %v49_v50 = vlaneseq  ;;  %v194_v55 = vmov 1966171168   ;;  %s320_s1 = inlined_call_operand.vmem [shape: f32[128,256], index: 1, kind: input, shape index: {}]   ;;  %s321_s0 = inlined_call_operand.vmem [shape: f32[1,128], index: 0, kind: input, shape index: {}]   ;;  %s322_s2 = inlined_call_operand.vmem [shape: f32[1,256], index: 2, kind: input, shape index: {}]   ;;  %s323_s3 = inlined_call_operand.vmem [shape: f32[1,256], index: 3, kind: output, shape index: {}]  }
   0x1   :  { %v16_v0 = vld [vmem:[%s320_s1 + $0x8] sm:$0xff]  ;;  %v18_v1 = vld [vmem:[%s320_s1 + $0x18] sm:$0xff]  ;;  %v15_v2 = vld [vmem:[%s320_s1] sm:$0xff]  ;;  %123 = vmatprep.mubr.f32.mxu0 %v193_v3  ;;  %v136_v56 = vunpack.c.l.s4 %v194_v55 }
   0x2   :  { %v159_v4 = vpack.c.bf16 %v18_v1, %v16_v0  ;;  %v17_v5 = vld [vmem:[%s320_s1 + $0x10] sm:$0xff]  ;;  %v20_v6 = vld [vmem:[%s320_s1 + $0x28] sm:$0xff]  ;;  %v22_v7 = vld [vmem:[%s320_s1 + $0x38] sm:$0xff]  ;;  %v50_v51 = vshrl.u32 %v49_v50, 7  ;;  %vm152_vm0 = vcmp.lt.s32.totalorder %v49_v50, 256 }
   0x3   :  { %v161_v8 = vpack.c.bf16 %v17_v5, %v15_v2  ;;  %v163_v9 = vpack.c.bf16 %v22_v7, %v20_v6  ;;  %v19_v10 = vld [vmem:[%s320_s1 + $0x20] sm:$0xff]  ;;  %v21_v11 = vld [vmem:[%s320_s1 + $0x30] sm:$0xff]  ;;  %v24_v12 = vld [vmem:[%s320_s1 + $0x48] sm:$0xff]  ;;  %v137_v60 = vunpack.c.0.s8 %v136_v56 }
   0x4   :  { %160 = vmatprep.subr.bf16.mxu0 %v159_v4  ;;  %v26_v13 = vld [vmem:[%s320_s1 + $0x58] sm:$0xff]  ;;  %v165_v14 = vpack.c.bf16 %v21_v11, %v19_v10  ;;  %v23_v16 = vld [vmem:[%s320_s1 + $0x40] sm:$0xff]  ;;  %v25_v17 = vld [vmem:[%s320_s1 + $0x50] sm:$0xff]  ;;  %v51_v52 = vsub.s32 0, %v50_v51  ;;  %v55_v54 = vsub.s32 1, %v50_v51 }
   0x5   :  { %162 = vmatpush1.bf16.msra.mxu0 %v161_v8  ;;  %v167_v15 = vpack.c.bf16 %v26_v13, %v24_v12  ;;  %v28_v18 = vld [vmem:[%s320_s1 + $0x68] sm:$0xff]  ;;  %v30_v19 = vld [vmem:[%s320_s1 + $0x78] sm:$0xff]  ;;  %v169_v20 = vpack.c.bf16 %v25_v17, %v23_v16  ;;  %v27_v22 = vld [vmem:[%s320_s1 + $0x60] sm:$0xff]  ;;  %v140_v2 = vsub.s32 %v137_v60, %v50_v51 }
   0x6   :  { %164 = vmatprep.subr.bf16.mxu0 %v163_v9  ;;  %v171_v21 = vpack.c.bf16 %v30_v19, %v28_v18  ;;  %v29_v23 = vld [vmem:[%s320_s1 + $0x70] sm:$0xff]  ;;  %v32_v24 = vld [vmem:[%s320_s1 + $0x88] sm:$0xff]  ;;  %v34_v25 = vld [vmem:[%s320_s1 + $0x98] sm:$0xff] }
   0x7   :  { %v173_v26 = vpack.c.bf16 %v29_v23, %v27_v22  ;;  %v175_v27 = vpack.c.bf16 %v34_v25, %v32_v24  ;;  %v31_v28 = vld [vmem:[%s320_s1 + $0x80] sm:$0xff]  ;;  %v33_v29 = vld [vmem:[%s320_s1 + $0x90] sm:$0xff]  ;;  %v36_v30 = vld [vmem:[%s320_s1 + $0xa8] sm:$0xff] }
   0x8   :  { %v38_v31 = vld [vmem:[%s320_s1 + $0xb8] sm:$0xff]  ;;  %v177_v32 = vpack.c.bf16 %v33_v29, %v31_v28  ;;  %v35_v34 = vld [vmem:[%s320_s1 + $0xa0] sm:$0xff]  ;;  %v37_v35 = vld [vmem:[%s320_s1 + $0xb0] sm:$0xff] }
   0x9   :  { %166 = vmatpush1.bf16.msra.mxu0 %v165_v14  ;;  %v179_v33 = vpack.c.bf16 %v38_v31, %v36_v30  ;;  %v40_v36 = vld [vmem:[%s320_s1 + $0xc8] sm:$0xff]  ;;  %v42_v37 = vld [vmem:[%s320_s1 + $0xd8] sm:$0xff]  ;;  %v181_v38 = vpack.c.bf16 %v37_v35, %v35_v34  ;;  %v39_v40 = vld [vmem:[%s320_s1 + $0xc0] sm:$0xff] }
   0xa   :  { %168 = vmatprep.subr.bf16.mxu0 %v167_v15  ;;  %v183_v39 = vpack.c.bf16 %v42_v37, %v40_v36  ;;  %v41_v41 = vld [vmem:[%s320_s1 + $0xd0] sm:$0xff]  ;;  %v44_v42 = vld [vmem:[%s320_s1 + $0xe8] sm:$0xff]  ;;  %v46_v43 = vld [vmem:[%s320_s1 + $0xf8] sm:$0xff] }
   0xb   :  { %v185_v44 = vpack.c.bf16 %v41_v41, %v39_v40  ;;  %v187_v45 = vpack.c.bf16 %v46_v43, %v44_v42  ;;  %v43_v46 = vld [vmem:[%s320_s1 + $0xe0] sm:$0xff]  ;;  %v45_v47 = vld [vmem:[%s320_s1 + $0xf0] sm:$0xff] }
   0xc   :  { %v189_v48 = vpack.c.bf16 %v45_v47, %v43_v46  ;;  %v14_v49 = vld [vmem:[%s321_s0] sm:$0x1] }
   0xd   :  { %170 = vmatpush1.bf16.msra.mxu0 %v169_v20  ;;  %v47_v53 = vld [vmem:[%s322_s2] sm:$0x3] }
   0xe   :  { %172 = vmatprep.subr.bf16.mxu0 %v171_v21  ;;  %v52_v57 = vrot.slane %v47_v53, %v51_v52  ;;  %v56_v58 = vrot.slane %v47_v53, %v55_v54 }
  0x11   :  { %174 = vmatpush1.bf16.msra.mxu0 %v173_v26 }
  0x12   :  { %176 = vmatprep.subr.bf16.mxu0 %v175_v27 }
  0x15   :  { %178 = vmatpush1.bf16.msra.mxu0 %v177_v32 }
  0x16   :  { %180 = vmatprep.subr.bf16.mxu0 %v179_v33 }
  0x19   :  { %182 = vmatpush1.bf16.msra.mxu0 %v181_v38 }
  0x1a   :  { %184 = vmatprep.subr.bf16.mxu0 %v183_v39 }
  0x1d   :  { %186 = vmatpush1.bf16.msra.mxu0 %v185_v44 }
  0x1e   :  { %188 = vmatprep.subr.bf16.mxu0 %v187_v45 }
  0x21   :  { %190 = vmatpush1.bf16.msra.mxu0 %v189_v48 }
  0x24   :  { %124 = vmatmul.mubr.f32.vlgmr.msra.gmra.mrb[0].mxu0 %v14_v49 }
  0xf7   :  { %v125_v59 = vpop.f32.mrb[0].mxu0 }
  0xf8   :  { %v126_v61 = vadd.f32 %v125_v59, %v52_v57  ;;  %v127_v62 = vpop.f32.mrb[1].mxu0 }
  0xf9   :  { %v128_v63 = vadd.f32 %v127_v62, %v56_v58 }
  0xfa   :  { %v130_v0 = vmax.f32 %v126_v61, -1.85 }
  0xfb   :  { %v131_v1 = vmax.f32 %v128_v63, -1.85 }
  0xfd   :  { %v134_v3 = vcombine.low %v130_v0, %v131_v1 }
  0xff   :  { %v141_v4 = vrot.slane %v134_v3, %v140_v2 }
 0x101   :  { %v148_v5 = vrot.slane %v141_v4, %v140_v2 }
 0x103   :  { %154 = vst.msk [vmem:[%s323_s3] sm:$0x3] %vm152_vm0, %v148_v5 }

</bundles_post_ra>
